<compile_context>
chip_gen: v6e
topology: v6e:2x2x1
jax: 0.10.0
libtpu: 0.0.40
codegen_flags: <defaults>
</compile_context>

<pallas_src>
import jax
import jax.numpy as jnp
from jax.experimental import pallas as pl
from jax.experimental.pallas import tpu as pltpu

_LANE = 128     # last dim of every block is a multiple of this (lane-dense)
_SUBLANE = 8    # f32 sublane count: batch tiles are multiples of this


def _round_up(x, m):
    return ((x + m - 1) // m) * m


def _ceil_div(a, b):
    return -(-a // b)


def _vmem_capacity_bytes():
    """Per-core VMEM capacity (64 MiB/TC on v7x, 128 MiB on v5e/v6e)."""
    try:
        return int(pltpu.get_tpu_info().vmem_capacity_bytes)
    except Exception:
        return 64 * 1024 * 1024   # conservative fallback (v7x per-TC)


# ---------------------------------------------------------------------------
# Kernels
# ---------------------------------------------------------------------------

def _ffnn_resident_kernel(x_ref, w1_ref, b1_ref, w2_ref, b2_ref, o_ref):
    """One batch tile, weights fully VMEM-resident.

    o = relu(x @ w1 + b1) @ w2 + b2, f32 accumulation on the MXU.
    """
    h = jnp.dot(x_ref[...].astype(w1_ref.dtype), w1_ref[...],
                preferred_element_type=jnp.float32)
    h = jnp.maximum(h + b1_ref[...], 0.0)          # fused bias + ReLU (VPU)
    out = jnp.dot(h.astype(w2_ref.dtype), w2_ref[...],
                  preferred_element_type=jnp.float32)
    o_ref[...] = (out + b2_ref[...]).astype(o_ref.dtype)


def _ffnn_stream_kernel(x_ref, w1_ref, b1_ref, w2_ref, b2_ref, o_ref, acc_ref):
    """Hidden-dim streamed variant for weights too large to keep resident.

    Grid = (batch tiles, hidden chunks).  The hidden axis is the reduction of
    the second matmul, accumulated in an f32 VMEM scratch.  Chunking hidden is
    exact because each hidden unit only depends on its own fc1 column/bias.
    """
    k = pl.program_id(1)

    @pl.when(k == 0)
    def _init():
        acc_ref[...] = jnp.zeros_like(acc_ref)

    h = jnp.dot(x_ref[...].astype(w1_ref.dtype), w1_ref[...],
                preferred_element_type=jnp.float32)
    h = jnp.maximum(h + b1_ref[...], 0.0)
    acc_ref[...] += jnp.dot(h.astype(w2_ref.dtype), w2_ref[...],
                            preferred_element_type=jnp.float32)

    @pl.when(k == pl.num_programs(1) - 1)
    def _finalize():
        o_ref[...] = (acc_ref[...] + b2_ref[...]).astype(o_ref.dtype)


# ---------------------------------------------------------------------------
# Wrapper
# ---------------------------------------------------------------------------

def prepare_ffnn_params(w1, b1, w2, b2):
    """Pad parameters to lane-aligned shapes ONCE at init (hoisted per review).

    Layouts (already transposed to (in, out)):
      w1: (D_in, H), b1: (H,), w2: (H, D_out), b2: (D_out,)
    Zero padding is exact: padded hidden units have zero fan-in/bias/fan-out
    and padded output columns are sliced off after the kernel.
    """
    d_in, hidden = w1.shape
    d_out = w2.shape[1]
    d_in_p = _round_up(d_in, _LANE)
    h_p = _round_up(hidden, _LANE)
    d_out_p = _round_up(d_out, _LANE)
    # TODO(synk): optionally quantize weights here (fp8 on v7x / int8 on
    # v5e-v6e) with per-channel scales applied after each dot to halve
    # resident-weight VMEM and roughly double MXU throughput.
    return {
        "w1": jnp.zeros((d_in_p, h_p), w1.dtype).at[:d_in, :hidden].set(w1),
        "b1": jnp.zeros((1, h_p), b1.dtype).at[0, :hidden].set(b1),
        "w2": jnp.zeros((h_p, d_out_p), w2.dtype).at[:hidden, :d_out].set(w2),
        "b2": jnp.zeros((1, d_out_p), b2.dtype).at[0, :d_out].set(b2),
        "dims": (int(d_in), int(hidden), int(d_out)),
    }


def ffnn_relu(x, params, *, tile_b=None, force_stream=False):
    """FFNN forward: relu(x @ w1 + b1) @ w2 + b2.  x: (B, D_in) -> (B, D_out)."""
    w1_p, b1_p, w2_p, b2_p = params["w1"], params["b1"], params["w2"], params["b2"]
    d_in, hidden, d_out = params["dims"]
    d_in_p, h_p = w1_p.shape
    d_out_p = w2_p.shape[1]

    B = x.shape[0]
    assert x.shape == (B, d_in)
    dtype = x.dtype
    act_bytes = jnp.dtype(dtype).itemsize
    w_bytes = jnp.dtype(w1_p.dtype).itemsize

    vmem_cap = _vmem_capacity_bytes()
    vmem_budget = int(0.8 * vmem_cap)    # headroom for compiler scratch

    # Pallas double-buffers every input by default, including the
    # grid-invariant weights, so resident weights really cost ~2x their size.
    resident_weight_bytes = (2 * (d_in_p * h_p + h_p * d_out_p) * w_bytes
                             + 2 * (h_p + d_out_p) * w_bytes)

    # Switch to the hidden-dim streaming kernel when resident weights would
    # eat most of this generation's VMEM (kicks in much earlier on v7x 64 MiB).
    use_stream = force_stream or resident_weight_bytes > int(0.55 * vmem_cap)

    if use_stream:
        tile_h = 512 if h_p % 512 == 0 else (256 if h_p % 256 == 0 else _LANE)
        fixed_bytes = (2 * (d_in_p * tile_h + tile_h * d_out_p + tile_h) * w_bytes
                       + 2 * d_out_p * w_bytes)
        per_row_bytes = (2 * d_in_p * act_bytes        # x tile (dbl buffered)
                         + 2 * d_out_p * act_bytes     # out tile (dbl buffered)
                         + tile_h * 4                  # f32 hidden chunk
                         + d_out_p * 4)                # f32 accumulator
    else:
        tile_h = h_p
        fixed_bytes = resident_weight_bytes
        per_row_bytes = (2 * d_in_p * act_bytes
                         + 2 * d_out_p * act_bytes
                         + h_p * 4                     # f32 hidden
                         + d_out_p * 4)                # f32 fc2 result

    # ---- batch tile: sized from leftover VMEM, capped at 512 rows ----------
    if tile_b is None:
        leftover = max(vmem_budget - fixed_bytes, _SUBLANE * per_row_bytes)
        cap = min(512, max((leftover // per_row_bytes) // _SUBLANE * _SUBLANE,
                           _SUBLANE))
        min_tiles = 2 if B >= 2 * _SUBLANE else 1       # shard across v7x TCs
        n_tiles = max(_ceil_div(B, cap), min_tiles)
        tile_b = _round_up(_ceil_div(B, n_tiles), _SUBLANE)
    else:
        tile_b = max(_round_up(tile_b, _SUBLANE), _SUBLANE)

    n_b_tiles = _ceil_div(B, tile_b)
    b_p = n_b_tiles * tile_b

    # Per-call activation padding only (weights were pre-padded at init).
    x_p = x
    if b_p != B or d_in_p != d_in:
        x_p = jnp.zeros((b_p, d_in_p), dtype).at[:B, :d_in].set(x)

    # ---- VMEM limit: accurate estimate (incl. double buffers) + headroom ---
    vmem_need = fixed_bytes + tile_b * per_row_bytes
    vmem_limit = int(min(max(int(1.5 * vmem_need), 4 * 1024 * 1024),
                         int(0.9 * vmem_cap)))
    vmem_limit = max(vmem_limit, vmem_need)    # never below the real footprint

    cost = pl.CostEstimate(
        flops=2 * B * (d_in * hidden + hidden * d_out),
        transcendentals=0,
        bytes_accessed=(B * d_in + d_in * hidden + hidden
                        + hidden * d_out + d_out + B * d_out) * act_bytes,
    )

    if use_stream:
        grid = (n_b_tiles, h_p // tile_h)
        in_specs = [
            pl.BlockSpec((tile_b, d_in_p), lambda i, k: (i, 0)),   # x (const in k)
            pl.BlockSpec((d_in_p, tile_h), lambda i, k: (0, k)),   # w1 chunk
            pl.BlockSpec((1, tile_h), lambda i, k: (0, k)),        # b1 chunk
            pl.BlockSpec((tile_h, d_out_p), lambda i, k: (k, 0)),  # w2 chunk
            pl.BlockSpec((1, d_out_p), lambda i, k: (0, 0)),       # b2
        ]
        out_specs = pl.BlockSpec((tile_b, d_out_p), lambda i, k: (i, 0))
        scratch_shapes = [pltpu.VMEM((tile_b, d_out_p), jnp.float32)]
        dim_sem = ("parallel", "arbitrary")
        kernel = _ffnn_stream_kernel
    else:
        grid = (n_b_tiles,)
        in_specs = [
            pl.BlockSpec((tile_b, d_in_p), lambda i: (i, 0)),      # x: streamed
            pl.BlockSpec((d_in_p, h_p), lambda i: (0, 0)),         # w1: resident
            pl.BlockSpec((1, h_p), lambda i: (0, 0)),              # b1: resident
            pl.BlockSpec((h_p, d_out_p), lambda i: (0, 0)),        # w2: resident
            pl.BlockSpec((1, d_out_p), lambda i: (0, 0)),          # b2: resident
        ]
        out_specs = pl.BlockSpec((tile_b, d_out_p), lambda i: (i, 0))
        scratch_shapes = []
        dim_sem = ("parallel",)
        kernel = _ffnn_resident_kernel

    out_p = pl.pallas_call(
        kernel,
        out_shape=jax.ShapeDtypeStruct((b_p, d_out_p), dtype),
        grid=grid,
        in_specs=in_specs,
        out_specs=out_specs,
        scratch_shapes=scratch_shapes,
        compiler_params=pltpu.CompilerParams(
            dimension_semantics=dim_sem,
            vmem_limit_bytes=vmem_limit,
        ),
        cost_estimate=cost,
    )(x_p, w1_p, b1_p, w2_p, b2_p)

    return out_p[:B, :d_out]


if __name__ == "__main__":
    # ---- Test 1: small shapes (resident-weight path) ------------------------
    batch, input_dim, hidden_dim, output_dim = 8, 16, 32, 8
    kx, kw1, kb1, kw2, kb2 = jax.random.split(jax.random.PRNGKey(0), 5)

    x = jax.random.normal(kx, (batch, input_dim), dtype=jnp.float32)
    bound1 = 1.0 / (input_dim ** 0.5)
    bound2 = 1.0 / (hidden_dim ** 0.5)
    w1 = jax.random.uniform(kw1, (input_dim, hidden_dim),
                            minval=-bound1, maxval=bound1, dtype=jnp.float32)
    b1 = jax.random.uniform(kb1, (hidden_dim,),
                            minval=-bound1, maxval=bound1, dtype=jnp.float32)
    w2 = jax.random.uniform(kw2, (hidden_dim, output_dim),
                            minval=-bound2, maxval=bound2, dtype=jnp.float32)
    b2 = jax.random.uniform(kb2, (output_dim,),
                            minval=-bound2, maxval=bound2, dtype=jnp.float32)

    params = prepare_ffnn_params(w1, b1, w2, b2)       # padded ONCE (hoisted)
    out = jax.block_until_ready(ffnn_relu(x, params))
    ref = jnp.maximum(x @ w1 + b1, 0.0) @ w2 + b2
    assert out.shape == (batch, output_dim)
    assert jnp.allclose(out, ref, atol=1e-5, rtol=1e-5)

    # ---- Test 2: exercise the hidden-dim streaming (accumulator) path -------
    batch2, input_dim2, hidden_dim2, output_dim2 = 24, 24, 300, 40
    kx2, kw1b, kb1b, kw2b, kb2b = jax.random.split(jax.random.PRNGKey(1), 5)
    x2 = jax.random.normal(kx2, (batch2, input_dim2), dtype=jnp.float32)
    bnd1 = 1.0 / (input_dim2 ** 0.5)
    bnd2 = 1.0 / (hidden_dim2 ** 0.5)
    w1b = jax.random.uniform(kw1b, (input_dim2, hidden_dim2),
                             minval=-bnd1, maxval=bnd1, dtype=jnp.float32)
    b1b = jax.random.uniform(kb1b, (hidden_dim2,),
                             minval=-bnd1, maxval=bnd1, dtype=jnp.float32)
    w2b = jax.random.uniform(kw2b, (hidden_dim2, output_dim2),
                             minval=-bnd2, maxval=bnd2, dtype=jnp.float32)
    b2b = jax.random.uniform(kb2b, (output_dim2,),
                             minval=-bnd2, maxval=bnd2, dtype=jnp.float32)

    params2 = prepare_ffnn_params(w1b, b1b, w2b, b2b)
    out2 = jax.block_until_ready(ffnn_relu(x2, params2, force_stream=True))
    ref2 = jnp.maximum(x2 @ w1b + b1b, 0.0) @ w2b + b2b
    assert out2.shape == (batch2, output_dim2)
    assert jnp.allclose(out2, ref2, atol=1e-4, rtol=1e-4)

    print("KERNEL_OK")
</pallas_src>

<mosaic_0001>
module attributes {stable_mosaic.version = 11 : i64} {
  func.func @_ffnn_resident_kernel(%arg0: i32, %arg1: memref<8x128xf32, #tpu.memory_space<vmem>>, %arg2: memref<128x128xf32, #tpu.memory_space<vmem>>, %arg3: memref<1x128xf32, #tpu.memory_space<vmem>>, %arg4: memref<128x128xf32, #tpu.memory_space<vmem>>, %arg5: memref<1x128xf32, #tpu.memory_space<vmem>>, %arg6: memref<8x128xf32, #tpu.memory_space<vmem>>) attributes {dimension_semantics = [#tpu.dimension_semantics<parallel>], iteration_bounds = array<i64: 1>, scalar_prefetch = 0 : i64, scratch_operands = 0 : i64, tpu.core_type = #tpu.core_type<tc>, window_params = [{transform_indices = @transform_0, window_bounds = array<i64: 8, 128>}, {pipeline_mode = #tpu.pipeline_mode<synchronous>, transform_indices = @transform_1, window_bounds = array<i64: 128, 128>}, {pipeline_mode = #tpu.pipeline_mode<synchronous>, transform_indices = @transform_2, window_bounds = array<i64: 1, 128>}, {pipeline_mode = #tpu.pipeline_mode<synchronous>, transform_indices = @transform_3, window_bounds = array<i64: 128, 128>}, {pipeline_mode = #tpu.pipeline_mode<synchronous>, transform_indices = @transform_4, window_bounds = array<i64: 1, 128>}, {transform_indices = @transform_5, window_bounds = array<i64: 8, 128>}]} {
    %c0 = arith.constant 0 : index
    %c0_0 = arith.constant 0 : index
    %0 = vector.load %arg1[%c0, %c0_0] : memref<8x128xf32, #tpu.memory_space<vmem>>, vector<8x128xf32>
    %c0_1 = arith.constant 0 : index
    %c0_2 = arith.constant 0 : index
    %1 = vector.load %arg2[%c0_1, %c0_2] : memref<128x128xf32, #tpu.memory_space<vmem>>, vector<128x128xf32>
    %cst = arith.constant dense<0.000000e+00> : vector<8x128xf32>
    %2 = tpu.matmul %0, %1, %cst {dimension_numbers = #tpu.dot_dimension_numbers<[1], [0], [0], [1], [0, 0, 1, 1], [], []>} : vector<8x128xf32>, vector<128x128xf32>, vector<8x128xf32> -> vector<8x128xf32>
    %c0_3 = arith.constant 0 : index
    %c0_4 = arith.constant 0 : index
    %3 = vector.load %arg3[%c0_3, %c0_4] : memref<1x128xf32, #tpu.memory_space<vmem>>, vector<1x128xf32>
    %4 = vector.broadcast %3 : vector<1x128xf32> to vector<8x128xf32>
    %5 = arith.addf %2, %4 : vector<8x128xf32>
    %cst_5 = arith.constant 0.000000e+00 : f32
    %6 = vector.broadcast %cst_5 : f32 to vector<8x128xf32>
    %7 = arith.maximumf %5, %6 : vector<8x128xf32>
    %c0_6 = arith.constant 0 : index
    %c0_7 = arith.constant 0 : index
    %8 = vector.load %arg4[%c0_6, %c0_7] : memref<128x128xf32, #tpu.memory_space<vmem>>, vector<128x128xf32>
    %cst_8 = arith.constant dense<0.000000e+00> : vector<8x128xf32>
    %9 = tpu.matmul %7, %8, %cst_8 {dimension_numbers = #tpu.dot_dimension_numbers<[1], [0], [0], [1], [0, 0, 1, 1], [], []>} : vector<8x128xf32>, vector<128x128xf32>, vector<8x128xf32> -> vector<8x128xf32>
    %c0_9 = arith.constant 0 : index
    %c0_10 = arith.constant 0 : index
    %10 = vector.load %arg5[%c0_9, %c0_10] : memref<1x128xf32, #tpu.memory_space<vmem>>, vector<1x128xf32>
    %11 = vector.broadcast %10 : vector<1x128xf32> to vector<8x128xf32>
    %12 = arith.addf %9, %11 : vector<8x128xf32>
    %c0_11 = arith.constant 0 : index
    %c0_12 = arith.constant 0 : index
    %13 = vector.load %arg6[%c0_11, %c0_12] : memref<8x128xf32, #tpu.memory_space<vmem>>, vector<8x128xf32>
    tpu.vector_store %arg6[%c0_11, %c0_12], %12 {strides = array<i32>} : memref<8x128xf32, #tpu.memory_space<vmem>>, vector<8x128xf32>,
    return
  }
  func.func @transform_0(%arg0: i32) -> (i32, i32) {
    %c0_i32 = arith.constant 0 : i32
    %c0_i32_0 = arith.constant 0 : i32
    return %arg0, %c0_i32 : i32, i32
  }
  func.func @transform_1(%arg0: i32) -> (i32, i32) {
    %c0_i32 = arith.constant 0 : i32
    %c0_i32_0 = arith.constant 0 : i32
    %c0_i32_1 = arith.constant 0 : i32
    return %c0_i32, %c0_i32_0 : i32, i32
  }
  func.func @transform_2(%arg0: i32) -> (i32, i32) {
    %c0_i32 = arith.constant 0 : i32
    %c0_i32_0 = arith.constant 0 : i32
    %c0_i32_1 = arith.constant 0 : i32
    return %c0_i32, %c0_i32_0 : i32, i32
  }
  func.func @transform_3(%arg0: i32) -> (i32, i32) {
    %c0_i32 = arith.constant 0 : i32
    %c0_i32_0 = arith.constant 0 : i32
    %c0_i32_1 = arith.constant 0 : i32
    return %c0_i32, %c0_i32_0 : i32, i32
  }
  func.func @transform_4(%arg0: i32) -> (i32, i32) {
    %c0_i32 = arith.constant 0 : i32
    %c0_i32_0 = arith.constant 0 : i32
    %c0_i32_1 = arith.constant 0 : i32
    return %c0_i32, %c0_i32_0 : i32, i32
  }
  func.func @transform_5(%arg0: i32) -> (i32, i32) {
    %c0_i32 = arith.constant 0 : i32
    %c0_i32_0 = arith.constant 0 : i32
    return %arg0, %c0_i32 : i32, i32
  }
}

</mosaic_0001>

<bundles_post_ra>
// kernel: tpu_custom_call.1
= control target key start
LH: loop header
LB: loop body
LE: loop exit
PB: predicated region body
PF: predicated region fallthrough
CT: control target
= control target key end

     0   :  { %10 = vsyncpa [#allocation3], 0  ;;  %s555_s0 = inlined_call_operand.hbm [shape: f32[8,128], index: 0, kind: input, shape index: {}]   ;;  %s556_s1 = inlined_call_operand.hbm [shape: f32[128,128], index: 1, kind: input, shape index: {}]   ;;  %s557_s2 = inlined_call_operand.vmem [shape: f32[1,128], index: 2, kind: input, shape index: {}]   ;;  %s558_s3 = inlined_call_operand.hbm [shape: f32[128,128], index: 3, kind: input, shape index: {}]   ;;  %s559_s4 = inlined_call_operand.vmem [shape: f32[1,128], index: 4, kind: input, shape index: {}]   ;;  %s560_s5 = inlined_call_operand.hbm [shape: f32[8,128], index: 5, kind: output, shape index: {}]  }
   0x1   :  { %11 = vsyncpa [#allocation6], 0 }
   0x2   :  { %12 = vsyncpa [#allocation4], 0  ;;  %s465_s18 = smov [#allocation5]  }
   0x3   :  { %s28_s19 = sshll.u32 %s465_s18, 4  ;;  %s29_s19 = int_to_ptr.vmem [resolvable:$true] %s28_s19 }
   0x4   :  { %s387_s20 = scalar_lea.vmem %s29_s19, 2048  ;;  %p392_p1 = scmp.lt.s32.totalorder %s29_s19, %s29_s19 }
   0x5   :  { %p388_p0 = scmp.ne.s32.totalorder %s29_s19, %s387_s20  ;;  %p393_p2 = scmp.lt.s32.totalorder %s387_s20, %s387_s20 }
   0x7   :  { %p394_p3 = por %p393_p2, %p392_p1 }
   0x9   :  { %p395_p4 = pnand %p394_p3, %p388_p0 }
   0xb   :  { %398 = shalt.err (!%p395_p4)
}
   0xc   :  { %s466_s21 = smov 128   ;;  %s467_s22 = smov 8  }
   0xd   :  { %34 = dma.hbm_to_vmem [thread:$0]  %s556_s1, 2048, %s29_s19, [#allocation6], %s466_s21, %s466_s21, %s467_s22  }
   0xe   :  { %s468_s25 = smov [#allocation2]   ;;  %s469_s27 = smov [#allocation7]  }
   0xf   :  { %s19_s26 = sshll.u32 %s468_s25, 4  ;;  %s42_s28 = sshll.u32 %s469_s27, 4  ;;  %s20_s26 = int_to_ptr.vmem [resolvable:$true] %s19_s26  ;;  %s43_s28 = int_to_ptr.vmem [resolvable:$true] %s42_s28 }
  0x10   :  { %s407_s29 = scalar_lea.vmem %s20_s26, 128  ;;  %p412_p6 = scmp.lt.s32.totalorder %s20_s26, %s20_s26 }
  0x11   :  { %p408_p5 = scmp.ne.s32.totalorder %s20_s26, %s407_s29  ;;  %p413_p7 = scmp.lt.s32.totalorder %s407_s29, %s407_s29 }
  0x13   :  { %p414_p8 = por %p413_p7, %p412_p6 }
  0x15   :  { %p415_p9 = pnand %p414_p8, %p408_p5 }
  0x17   :  { %418 = shalt.err (!%p415_p9)
}
  0x18   :  { %22 = dma.hbm_to_vmem [thread:$0]  %s555_s0, 128, %s20_s26, [#allocation3]  }
  0x19   :  { %s427_s7 = scalar_lea.vmem %s43_s28, 2048  ;;  %p432_p11 = scmp.lt.s32.totalorder %s43_s28, %s43_s28 }
  0x1a   :  { %p428_p10 = scmp.ne.s32.totalorder %s43_s28, %s427_s7  ;;  %p433_p12 = scmp.lt.s32.totalorder %s427_s7, %s427_s7 }
  0x1c   :  { %p434_p13 = por %p433_p12, %p432_p11 }
  0x1e   :  { %p435_p0 = pnand %p434_p13, %p428_p10 }
  0x20   :  { %438 = shalt.err (!%p435_p0)
}
  0x21   :  { %48 = dma.hbm_to_vmem [thread:$0]  %s558_s3, 2048, %s43_s28, [#allocation6], %s466_s21, %s466_s21, %s467_s22  }
  0x22   :  { %459 = dma.done.wait [#allocation3], 128  }
  0x23   :  { %460 = vsyncadd [#allocation3], 4294967168 }
  0x24   :  { %461 = dma.done.wait [#allocation6], 4096  }
  0x25   :  { %462 = vsyncadd [#allocation6], 4294963200  ;;  %v470_v0 = vmov 0.0   ;;  %vm471_vm0 = vmmov 0   ;;  %v76_v1 = vld [vmem:[#allocation5 + $0x78] sm:$0xff]  ;;  %v75_v2 = vld [vmem:[#allocation5 + $0x70] sm:$0xff] }
  0x26   :  { %301 = vmatprep.subr.mxu0 %v470_v0  ;;  %333 = vmatprep.mubr.msk.f32.mxu0 %vm471_vm0, %v470_v0  ;;  %v74_v3 = vld [vmem:[#allocation5 + $0x68] sm:$0xff]  ;;  %v73_v4 = vld [vmem:[#allocation5 + $0x60] sm:$0xff]  ;;  %v170_v5 = vld [vmem:[#allocation7 + $0x78] sm:$0xff]  ;;  %s472_s11 = smov [#allocation8]  }
  0x27   :  { %336 = vmatprep.subr.mxu1 %v470_v0  ;;  %368 = vmatprep.mubr.msk.f32.mxu1 %vm471_vm0, %v470_v0  ;;  %v72_v6 = vld [vmem:[#allocation5 + $0x58] sm:$0xff]  ;;  %v169_v7 = vld [vmem:[#allocation7 + $0x70] sm:$0xff]  ;;  %v168_v8 = vld [vmem:[#allocation7 + $0x68] sm:$0xff]  ;;  %s255_s12 = sshll.u32 %s472_s11, 4  ;;  %s256_s12 = int_to_ptr.vmem [resolvable:$true] %s255_s12 }
  0x28   :  { %302 = vmatpush3.msra.mxu0 %v76_v1  ;;  %337 = vmatpush3.msra.mxu1 %v170_v5  ;;  %v71_v9 = vld [vmem:[#allocation5 + $0x50] sm:$0xff]  ;;  %v167_v10 = vld [vmem:[#allocation7 + $0x60] sm:$0xff]  ;;  %v70_v11 = vld [vmem:[#allocation5 + $0x48] sm:$0xff]  ;;  %s439_s13 = scalar_lea.vmem %s256_s12, 128  ;;  %p444_p2 = scmp.lt.s32.totalorder %s256_s12, %s256_s12 }
  0x29   :  { %303 = vmatprep.subr.mxu0 %v470_v0  ;;  %338 = vmatprep.subr.mxu1 %v470_v0  ;;  %v166_v12 = vld [vmem:[#allocation7 + $0x58] sm:$0xff]  ;;  %v69_v13 = vld [vmem:[#allocation5 + $0x40] sm:$0xff]  ;;  %v165_v14 = vld [vmem:[#allocation7 + $0x50] sm:$0xff]  ;;  %p440_p1 = scmp.ne.s32.totalorder %s256_s12, %s439_s13  ;;  %p445_p3 = scmp.lt.s32.totalorder %s439_s13, %s439_s13 }
  0x2a   :  { %304 = vmatpush3.msra.mxu0 %v75_v2  ;;  %339 = vmatpush3.msra.mxu1 %v169_v7  ;;  %v68_v15 = vld [vmem:[#allocation5 + $0x38] sm:$0xff]  ;;  %v164_v16 = vld [vmem:[#allocation7 + $0x48] sm:$0xff]  ;;  %v67_v17 = vld [vmem:[#allocation5 + $0x30] sm:$0xff] }
  0x2b   :  { %305 = vmatprep.subr.mxu0 %v470_v0  ;;  %340 = vmatprep.subr.mxu1 %v470_v0  ;;  %v163_v18 = vld [vmem:[#allocation7 + $0x40] sm:$0xff]  ;;  %v66_v19 = vld [vmem:[#allocation5 + $0x28] sm:$0xff]  ;;  %v162_v20 = vld [vmem:[#allocation7 + $0x38] sm:$0xff]  ;;  %p446_p4 = por %p445_p3, %p444_p2 }
  0x2c   :  { %306 = vmatpush3.msra.mxu0 %v74_v3  ;;  %341 = vmatpush3.msra.mxu1 %v168_v8  ;;  %v65_v21 = vld [vmem:[#allocation5 + $0x20] sm:$0xff]  ;;  %v161_v22 = vld [vmem:[#allocation7 + $0x30] sm:$0xff]  ;;  %v64_v23 = vld [vmem:[#allocation5 + $0x18] sm:$0xff] }
  0x2d   :  { %307 = vmatprep.subr.mxu0 %v470_v0  ;;  %342 = vmatprep.subr.mxu1 %v470_v0  ;;  %v160_v24 = vld [vmem:[#allocation7 + $0x28] sm:$0xff]  ;;  %v63_v25 = vld [vmem:[#allocation5 + $0x10] sm:$0xff]  ;;  %v159_v26 = vld [vmem:[#allocation7 + $0x20] sm:$0xff]  ;;  %p447_p5 = pnand %p446_p4, %p440_p1 }
  0x2e   :  { %308 = vmatpush3.msra.mxu0 %v73_v4  ;;  %343 = vmatpush3.msra.mxu1 %v167_v10  ;;  %v62_v27 = vld [vmem:[#allocation5 + $0x8] sm:$0xff]  ;;  %v158_v28 = vld [vmem:[#allocation7 + $0x18] sm:$0xff]  ;;  %v61_v29 = vld [vmem:[#allocation5] sm:$0xff] }
  0x2f   :  { %309 = vmatprep.subr.mxu0 %v470_v0  ;;  %344 = vmatprep.subr.mxu1 %v470_v0  ;;  %v60_v30 = vld [vmem:[#allocation2] sm:$0xff]  ;;  %v157_v31 = vld [vmem:[#allocation7 + $0x10] sm:$0xff]  ;;  %v156_v32 = vld [vmem:[#allocation7 + $0x8] sm:$0xff] }
  0x30   :  { %310 = vmatpush3.msra.mxu0 %v72_v6  ;;  %345 = vmatpush3.msra.mxu1 %v166_v12  ;;  %v155_v33 = vld [vmem:[#allocation7] sm:$0xff]  ;;  %v265_v34 = vld [vmem:[%s557_s2] ss:$0 sm:$0xff] }
  0x31   :  { %311 = vmatprep.subr.mxu0 %v470_v0  ;;  %346 = vmatprep.subr.mxu1 %v470_v0  ;;  %v266_v39 = vld [vmem:[%s559_s4] ss:$0 sm:$0xff] }
  0x32   :  { %312 = vmatpush3.msra.mxu0 %v71_v9  ;;  %347 = vmatpush3.msra.mxu1 %v165_v14 }
  0x33   :  { %313 = vmatprep.subr.mxu0 %v470_v0  ;;  %348 = vmatprep.subr.mxu1 %v470_v0 }
  0x34   :  { %314 = vmatpush3.msra.mxu0 %v70_v11  ;;  %349 = vmatpush3.msra.mxu1 %v164_v16 }
  0x35   :  { %315 = vmatprep.subr.mxu0 %v470_v0  ;;  %350 = vmatprep.subr.mxu1 %v470_v0 }
  0x36   :  { %316 = vmatpush3.msra.mxu0 %v69_v13  ;;  %351 = vmatpush3.msra.mxu1 %v163_v18 }
  0x37   :  { %317 = vmatprep.subr.mxu0 %v470_v0  ;;  %352 = vmatprep.subr.mxu1 %v470_v0 }
  0x38   :  { %318 = vmatpush3.msra.mxu0 %v68_v15  ;;  %353 = vmatpush3.msra.mxu1 %v162_v20 }
  0x39   :  { %319 = vmatprep.subr.mxu0 %v470_v0  ;;  %354 = vmatprep.subr.mxu1 %v470_v0 }
  0x3a   :  { %320 = vmatpush3.msra.mxu0 %v67_v17  ;;  %355 = vmatpush3.msra.mxu1 %v161_v22 }
  0x3b   :  { %321 = vmatprep.subr.mxu0 %v470_v0  ;;  %356 = vmatprep.subr.mxu1 %v470_v0 }
  0x3c   :  { %322 = vmatpush3.msra.mxu0 %v66_v19  ;;  %357 = vmatpush3.msra.mxu1 %v160_v24 }
  0x3d   :  { %323 = vmatprep.subr.mxu0 %v470_v0  ;;  %358 = vmatprep.subr.mxu1 %v470_v0 }
  0x3e   :  { %324 = vmatpush3.msra.mxu0 %v65_v21  ;;  %359 = vmatpush3.msra.mxu1 %v159_v26 }
  0x3f   :  { %325 = vmatprep.subr.mxu0 %v470_v0  ;;  %360 = vmatprep.subr.mxu1 %v470_v0 }
  0x40   :  { %326 = vmatpush3.msra.mxu0 %v64_v23  ;;  %361 = vmatpush3.msra.mxu1 %v158_v28 }
  0x41   :  { %327 = vmatprep.subr.mxu0 %v470_v0  ;;  %362 = vmatprep.subr.mxu1 %v470_v0 }
  0x42   :  { %328 = vmatpush3.msra.mxu0 %v63_v25  ;;  %363 = vmatpush3.msra.mxu1 %v157_v31 }
  0x43   :  { %329 = vmatprep.subr.mxu0 %v470_v0  ;;  %364 = vmatprep.subr.mxu1 %v470_v0 }
  0x44   :  { %330 = vmatpush3.msra.mxu0 %v62_v27  ;;  %365 = vmatpush3.msra.mxu1 %v156_v32 }
  0x45   :  { %331 = vmatprep.subr.mxu0 %v470_v0  ;;  %366 = vmatprep.subr.mxu1 %v470_v0 }
  0x46   :  { %332 = vmatpush3.msra.mxu0 %v61_v29  ;;  %367 = vmatpush3.msra.mxu1 %v155_v33 }
  0x47   :  { %334 = vmatmul.mubr.f32.vlgmr.msra.gmra.mxu0 %v60_v30 }
 0x107   :  { %v150_v35 = vpop.f32.mrf.mxu0 }
 0x108   :  { %v151_v36 = vadd.f32 %v265_v34, %v150_v35 }
 0x109   :  { %v335_v37 = vpop.f32.mrf.mxu0 }
 0x10a   :  { %v154_v38 = vmax.f32 %v151_v36, 0.0 }
 0x10c   :  { %369 = vmatmul.mubr.f32.vlgmr.msra.gmra.mxu1 %v154_v38 }
 0x1cc   :  { %v244_v40 = vpop.f32.mrf.mxu1 }
 0x1cd   :  { %v245_v41 = vadd.f32 %v266_v39, %v244_v40 }
 0x1ce   :  { %v370_v42 = vpop.f32.mrf.mxu1 }
 0x1cf   :  { %248 = vst [vmem:[#allocation8] sm:$0xff] %v245_v41 }
 0x1d0   :  { %450 = shalt.err (!%p447_p5)
}
 0x1d1   :  { %258 = dma.vmem_to_hbm [thread:$0]  %s256_s12, 128, %s560_s5, [#allocation4]  }
 0x1d2   :  { %463 = dma.done.wait [#allocation4], 128  }
 0x1d3   :  { %464 = vsyncadd [#allocation4], 4294967168 }
 0x1d4   :  { %262 = vsyncpa [#allocation3], 1 }
 0x1d5   :  { %263 = vsyncpa [#allocation6], 1 }
 0x1d6   :  { %264 = vsyncpa [#allocation4], 1 }

</bundles_post_ra>
